<compile_context>
chip_gen: v6e
topology: v6e:2x2x1
jax: 0.10.0
libtpu: 0.0.40
codegen_flags: <defaults>
</compile_context>

<pallas_src>
import functools

import jax
import jax.numpy as jnp
from jax.experimental import pallas as pl
from jax.experimental.pallas import tpu as pltpu

_INV_SQRT2 = 0.7071067811865475


def _gelu(x):  # exact (erf) GELU, matching torch.nn.GELU()
    return 0.5 * x * (1.0 + jax.lax.erf(x * _INV_SQRT2))


def _layernorm(x, g, b, eps=1e-5):
    mu = jnp.mean(x, axis=-1, keepdims=True)
    xc = x - mu
    var = jnp.mean(xc * xc, axis=-1, keepdims=True)
    return xc * jax.lax.rsqrt(var + eps) * g + b


def _row_tile(m, target=256):
    """Largest row tile <= target that divides m (128/256-aligned when possible)."""
    if m <= target:
        return m
    for t in range(target, 7, -8):
        if m % t == 0:
            return t
    return m


# ----------------------------------------------------------------------------
# Fused attention block kernel:  Attn(LN1(fx)) + fx   (one grid step per batch)
# ----------------------------------------------------------------------------
def _attention_block_kernel(temp_ref, fx_ref, lng_ref, lnb_ref,
                            wcf_ref, bcf_ref, wcx_ref, bcx_ref,
                            ws_ref, bs_ref, wq_ref, wk_ref, wv_ref,
                            wo_ref, bo_ref,
                            o_ref,
                            pad_ref, fxm_ref, xm_ref,
                            *, H, W, heads, dim_head, scale):
    N = H * W
    inner = heads * dim_head
    C = fx_ref.shape[-1]

    fx = fx_ref[0].astype(jnp.float32)                        # (N, C) residual input
    xn = _layernorm(fx, lng_ref[...], lnb_ref[...])           # LayerNorm1

    # Zero-padded LN activations for the 3x3 convolutions (pad=1).
    pad_ref[...] = jnp.zeros_like(pad_ref)
    for h in range(H):
        pad_ref[h + 1, 1:W + 1, :] = xn[h * W:(h + 1) * W, :]

    # Both conv projections: shifted-accumulate over the 9 taps, bf16 MXU / f32 acc.
    wcf_taps = [wcf_ref[t].astype(jnp.bfloat16) for t in range(9)]   # (C, inner) each
    wcx_taps = [wcx_ref[t].astype(jnp.bfloat16) for t in range(9)]
    for h in range(H):
        acc_f = jnp.zeros((W, inner), jnp.float32)
        acc_x = jnp.zeros((W, inner), jnp.float32)
        for dh in range(3):
            for dw in range(3):
                patch = pad_ref[h + dh, dw:dw + W, :].astype(jnp.bfloat16)  # (W, C)
                tap = dh * 3 + dw
                acc_f = acc_f + jnp.dot(patch, wcf_taps[tap],
                                        preferred_element_type=jnp.float32)
                acc_x = acc_x + jnp.dot(patch, wcx_taps[tap],
                                        preferred_element_type=jnp.float32)
        fxm_ref[h * W:(h + 1) * W, :] = acc_f + bcf_ref[...]
        xm_ref[h * W:(h + 1) * W, :] = acc_x + bcx_ref[...]

    # Physics attention: all heads handled here; heads live on the lane axis.
    ws = ws_ref[...].astype(jnp.bfloat16)                     # (D, G) shared slice proj
    acc_out = jnp.zeros((N, C), jnp.float32)
    for hh in range(heads):
        lo = hh * dim_head
        xh = xm_ref[:, lo:lo + dim_head]                      # (N, D) f32
        fxh = fxm_ref[:, lo:lo + dim_head]                    # (N, D) f32
        t = temp_ref[hh]                                      # per-head temperature

        logits = jnp.dot(xh.astype(jnp.bfloat16), ws,
                         preferred_element_type=jnp.float32)
        logits = (logits + bs_ref[...]) / t                   # (N, G)
        logits = logits - jnp.max(logits, axis=-1, keepdims=True)
        e = jnp.exp(logits)
        sw = e * pl.reciprocal(jnp.sum(e, axis=-1, keepdims=True), approx=True)

        snorm = jnp.sum(sw, axis=0, keepdims=True)            # (1, G) sublane reduce
        sw_div = sw * pl.reciprocal(snorm + 1e-5, approx=True)
        tok = jax.lax.dot_general(sw_div, fxh, (((0,), (0,)), ((), ())),
                                  preferred_element_type=jnp.float32)   # (G, D)

        q = jnp.dot(tok, wq_ref[...], preferred_element_type=jnp.float32)
        k = jnp.dot(tok, wk_ref[...], preferred_element_type=jnp.float32)
        v = jnp.dot(tok, wv_ref[...], preferred_element_type=jnp.float32)
        dots = jax.lax.dot_general(q, k, (((1,), (1,)), ((), ())),
                                   preferred_element_type=jnp.float32) * scale
        dots = dots - jnp.max(dots, axis=-1, keepdims=True)
        a = jnp.exp(dots)
        attn = a * pl.reciprocal(jnp.sum(a, axis=-1, keepdims=True), approx=True)
        out_tok = jnp.dot(attn, v, preferred_element_type=jnp.float32)  # (G, D)

        out_h = jnp.dot(sw.astype(jnp.bfloat16), out_tok.astype(jnp.bfloat16),
                        preferred_element_type=jnp.float32)             # (N, D)
        # accumulate the to_out projection head-slice by head-slice
        acc_out = acc_out + jnp.dot(
            out_h.astype(jnp.bfloat16),
            wo_ref[lo:lo + dim_head, :].astype(jnp.bfloat16),
            preferred_element_type=jnp.float32)                         # (N, C)

    o_ref[0] = (acc_out + bo_ref[...] + fx).astype(o_ref.dtype)


def attention_block(fx, p, cfg):
    """fx: (B, N, C) -> Attn(LN1(fx)) + fx."""
    B, N, C = fx.shape
    H, W = cfg["H"], cfg["W"]
    heads, dim_head = cfg["n_head"], cfg["dim_head"]
    inner = heads * dim_head
    D = dim_head
    G = p["slice_w"].shape[1]

    kernel = functools.partial(_attention_block_kernel, H=H, W=W, heads=heads,
                               dim_head=dim_head, scale=dim_head ** -0.5)
    return pl.pallas_call(
        kernel,
        out_shape=jax.ShapeDtypeStruct((B, N, C), jnp.float32),
        grid=(B,),
        in_specs=[
            pl.BlockSpec(memory_space=pltpu.MemorySpace.SMEM),       # temperature (heads,)
            pl.BlockSpec((1, N, C), lambda b: (b, 0, 0)),            # fx
            pl.BlockSpec((1, C), lambda b: (0, 0)),                  # ln1 gamma
            pl.BlockSpec((1, C), lambda b: (0, 0)),                  # ln1 beta
            pl.BlockSpec((9, C, inner), lambda b: (0, 0, 0)),        # conv_fx W (tap, Cin, Cout)
            pl.BlockSpec((1, inner), lambda b: (0, 0)),              # conv_fx b
            pl.BlockSpec((9, C, inner), lambda b: (0, 0, 0)),        # conv_x W
            pl.BlockSpec((1, inner), lambda b: (0, 0)),              # conv_x b
            pl.BlockSpec((D, G), lambda b: (0, 0)),                  # slice W
            pl.BlockSpec((1, G), lambda b: (0, 0)),                  # slice b
            pl.BlockSpec((D, D), lambda b: (0, 0)),                  # Wq
            pl.BlockSpec((D, D), lambda b: (0, 0)),                  # Wk
            pl.BlockSpec((D, D), lambda b: (0, 0)),                  # Wv
            pl.BlockSpec((inner, C), lambda b: (0, 0)),              # out proj W
            pl.BlockSpec((1, C), lambda b: (0, 0)),                  # out proj b
        ],
        out_specs=pl.BlockSpec((1, N, C), lambda b: (b, 0, 0)),
        scratch_shapes=[
            pltpu.VMEM((H + 2, W + 2, C), jnp.float32),              # padded LN activations
            pltpu.VMEM((N, inner), jnp.float32),                     # fx_mid (heads lane-packed)
            pltpu.VMEM((N, inner), jnp.float32),                     # x_mid
        ],
        compiler_params=pltpu.CompilerParams(
            dimension_semantics=("parallel",)),
    )(p["temperature"].astype(jnp.float32),
      fx.astype(jnp.float32),
      p["ln1_w"].reshape(1, C).astype(jnp.float32),
      p["ln1_b"].reshape(1, C).astype(jnp.float32),
      p["conv_fx_w"].astype(jnp.float32),
      p["conv_fx_b"].reshape(1, inner).astype(jnp.float32),
      p["conv_x_w"].astype(jnp.float32),
      p["conv_x_b"].reshape(1, inner).astype(jnp.float32),
      p["slice_w"].astype(jnp.float32),
      p["slice_b"].reshape(1, G).astype(jnp.float32),
      p["wq"].astype(jnp.float32),
      p["wk"].astype(jnp.float32),
      p["wv"].astype(jnp.float32),
      p["out_w"].astype(jnp.float32),
      p["out_b"].reshape(1, C).astype(jnp.float32))


# ----------------------------------------------------------------------------
# Fused row-wise kernels: preprocess MLP, LN2+MLP+residual, LN3+final proj
# ----------------------------------------------------------------------------
def _preprocess_kernel(x_ref, w1_ref, b1_ref, w2_ref, b2_ref, o_ref):
    x = x_ref[...].astype(jnp.float32)
    h = jnp.dot(x.astype(jnp.bfloat16), w1_ref[...].astype(jnp.bfloat16),
                preferred_element_type=jnp.float32) + b1_ref[...]
    h = _gelu(h)
    y = jnp.dot(h.astype(jnp.bfloat16), w2_ref[...].astype(jnp.bfloat16),
                preferred_element_type=jnp.float32) + b2_ref[...]
    o_ref[...] = y.astype(o_ref.dtype)


def preprocess_mlp(x2d, w1, b1, w2, b2):
    M, K = x2d.shape
    Ch = w1.shape[1]
    C = w2.shape[1]
    tm = _row_tile(M)
    return pl.pallas_call(
        _preprocess_kernel,
        out_shape=jax.ShapeDtypeStruct((M, C), jnp.float32),
        grid=(M // tm,),
        in_specs=[
            pl.BlockSpec((tm, K), lambda i: (i, 0)),
            pl.BlockSpec((K, Ch), lambda i: (0, 0)),
            pl.BlockSpec((1, Ch), lambda i: (0, 0)),
            pl.BlockSpec((Ch, C), lambda i: (0, 0)),
            pl.BlockSpec((1, C), lambda i: (0, 0)),
        ],
        out_specs=pl.BlockSpec((tm, C), lambda i: (i, 0)),
        compiler_params=pltpu.CompilerParams(dimension_semantics=("parallel",)),
    )(x2d.astype(jnp.float32), w1.astype(jnp.float32),
      b1.reshape(1, Ch).astype(jnp.float32),
      w2.astype(jnp.float32), b2.reshape(1, C).astype(jnp.float32))


def _mlp_residual_kernel(x_ref, g_ref, b_ref, w1_ref, b1_ref, w2_ref, b2_ref, o_ref):
    x = x_ref[...].astype(jnp.float32)
    xn = _layernorm(x, g_ref[...], b_ref[...])
    h = jnp.dot(xn.astype(jnp.bfloat16), w1_ref[...].astype(jnp.bfloat16),
                preferred_element_type=jnp.float32) + b1_ref[...]
    h = _gelu(h)
    y = jnp.dot(h.astype(jnp.bfloat16), w2_ref[...].astype(jnp.bfloat16),
                preferred_element_type=jnp.float32) + b2_ref[...]
    o_ref[...] = (y + x).astype(o_ref.dtype)


def mlp_residual(x2d, p):
    M, C = x2d.shape
    Ch = p["mlp_w1"].shape[1]
    tm = _row_tile(M)
    return pl.pallas_call(
        _mlp_residual_kernel,
        out_shape=jax.ShapeDtypeStruct((M, C), jnp.float32),
        grid=(M // tm,),
        in_specs=[
            pl.BlockSpec((tm, C), lambda i: (i, 0)),
            pl.BlockSpec((1, C), lambda i: (0, 0)),
            pl.BlockSpec((1, C), lambda i: (0, 0)),
            pl.BlockSpec((C, Ch), lambda i: (0, 0)),
            pl.BlockSpec((1, Ch), lambda i: (0, 0)),
            pl.BlockSpec((Ch, C), lambda i: (0, 0)),
            pl.BlockSpec((1, C), lambda i: (0, 0)),
        ],
        out_specs=pl.BlockSpec((tm, C), lambda i: (i, 0)),
        compiler_params=pltpu.CompilerParams(dimension_semantics=("parallel",)),
    )(x2d.astype(jnp.float32),
      p["ln2_w"].reshape(1, C).astype(jnp.float32),
      p["ln2_b"].reshape(1, C).astype(jnp.float32),
      p["mlp_w1"].astype(jnp.float32),
      p["mlp_b1"].reshape(1, Ch).astype(jnp.float32),
      p["mlp_w2"].astype(jnp.float32),
      p["mlp_b2"].reshape(1, C).astype(jnp.float32))


def _final_kernel(x_ref, g_ref, b_ref, w_ref, bo_ref, o_ref):
    x = x_ref[...].astype(jnp.float32)
    xn = _layernorm(x, g_ref[...], b_ref[...])
    y = jnp.dot(xn.astype(jnp.bfloat16), w_ref[...].astype(jnp.bfloat16),
                preferred_element_type=jnp.float32) + bo_ref[...]
    o_ref[...] = y.astype(o_ref.dtype)


def final_projection(x2d, p):
    M, C = x2d.shape
    O = p["mlp2_w"].shape[1]
    tm = _row_tile(M)
    return pl.pallas_call(
        _final_kernel,
        out_shape=jax.ShapeDtypeStruct((M, O), jnp.float32),
        grid=(M // tm,),
        in_specs=[
            pl.BlockSpec((tm, C), lambda i: (i, 0)),
            pl.BlockSpec((1, C), lambda i: (0, 0)),
            pl.BlockSpec((1, C), lambda i: (0, 0)),
            pl.BlockSpec((C, O), lambda i: (0, 0)),
            pl.BlockSpec((1, O), lambda i: (0, 0)),
        ],
        out_specs=pl.BlockSpec((tm, O), lambda i: (i, 0)),
        compiler_params=pltpu.CompilerParams(dimension_semantics=("parallel",)),
    )(x2d.astype(jnp.float32),
      p["ln3_w"].reshape(1, C).astype(jnp.float32),
      p["ln3_b"].reshape(1, C).astype(jnp.float32),
      p["mlp2_w"].astype(jnp.float32),
      p["mlp2_b"].reshape(1, O).astype(jnp.float32))


# ----------------------------------------------------------------------------
# Model composition
# ----------------------------------------------------------------------------
def transolver_block(fx, p, cfg, last_layer):
    B, N, C = fx.shape
    fx = attention_block(fx, p, cfg)                                   # Attn(LN1) + fx
    fx = mlp_residual(fx.reshape(B * N, C), p).reshape(B, N, C)        # MLP(LN2) + fx
    if last_layer:
        out = final_projection(fx.reshape(B * N, C), p)                # mlp2(LN3)
        return out.reshape(B, N, -1)
    return fx


def model_forward(params, cfg, x, fx):
    """x: (B, N, space_dim), fx: (B, N, fun_dim) -> (B, N, out_dim)."""
    B, N, _ = x.shape
    # fx is not None branch: concat coords + function values, preprocess MLP
    t = jnp.concatenate([x, fx], axis=-1).reshape(B * N, -1)
    h = preprocess_mlp(t, params["pre_w1"], params["pre_b1"],
                       params["pre_w2"], params["pre_b2"])
    h = h.reshape(B, N, cfg["n_hidden"])
    # TODO(synk): placeholder (fx is None), Time_Input and unified_pos paths not exercised here.
    nblk = len(params["blocks"])
    for i, bp in enumerate(params["blocks"]):
        h = transolver_block(h, bp, cfg, last_layer=(i == nblk - 1))
    return h


# ----------------------------------------------------------------------------
# Deterministic parameter init (shapes match the torch module __init__)
# ----------------------------------------------------------------------------
def _tn(key, shape, std=0.02):
    return std * jax.random.truncated_normal(key, -2.0, 2.0, shape, jnp.float32)


def init_params(key, cfg):
    C = cfg["n_hidden"]
    D = cfg["dim_head"]
    G = cfg["slice_num"]
    Hh = cfg["n_head"]
    inner = Hh * D
    in_dim = cfg["fun_dim"] + cfg["space_dim"]
    mlp_hidden = C * cfg["mlp_ratio"]
    keys = iter(jax.random.split(key, 256))

    params = {
        "pre_w1": _tn(next(keys), (in_dim, 2 * C)),
        "pre_b1": jnp.zeros((2 * C,), jnp.float32),
        "pre_w2": _tn(next(keys), (2 * C, C)),
        "pre_b2": jnp.zeros((C,), jnp.float32),
        "blocks": [],
    }
    for i in range(cfg["n_layers"]):
        bp = {
            "ln1_w": jnp.ones((C,), jnp.float32), "ln1_b": jnp.zeros((C,), jnp.float32),
            # conv weights stored as (tap=kh*3+kw, C_in, C_out) == torch OIHW transposed
            "conv_fx_w": _tn(next(keys), (9, C, inner)),
            "conv_fx_b": jnp.zeros((inner,), jnp.float32),
            "conv_x_w": _tn(next(keys), (9, C, inner)),
            "conv_x_b": jnp.zeros((inner,), jnp.float32),
            "slice_w": _tn(next(keys), (D, G)),
            "slice_b": jnp.zeros((G,), jnp.float32),
            "temperature": 0.5 * jnp.ones((Hh,), jnp.float32),
            "wq": _tn(next(keys), (D, D)),
            "wk": _tn(next(keys), (D, D)),
            "wv": _tn(next(keys), (D, D)),
            "out_w": _tn(next(keys), (inner, C)),
            "out_b": jnp.zeros((C,), jnp.float32),
            "ln2_w": jnp.ones((C,), jnp.float32), "ln2_b": jnp.zeros((C,), jnp.float32),
            "mlp_w1": _tn(next(keys), (C, mlp_hidden)),
            "mlp_b1": jnp.zeros((mlp_hidden,), jnp.float32),
            "mlp_w2": _tn(next(keys), (mlp_hidden, C)),
            "mlp_b2": jnp.zeros((C,), jnp.float32),
        }
        if i == cfg["n_layers"] - 1:
            bp["ln3_w"] = jnp.ones((C,), jnp.float32)
            bp["ln3_b"] = jnp.zeros((C,), jnp.float32)
            bp["mlp2_w"] = _tn(next(keys), (C, cfg["out_dim"]))
            bp["mlp2_b"] = jnp.zeros((cfg["out_dim"],), jnp.float32)
        params["blocks"].append(bp)
    return params


if __name__ == "__main__":
    cfg = dict(space_dim=2, fun_dim=1, n_hidden=32, n_head=4, dim_head=8,
               n_layers=2, mlp_ratio=1, out_dim=1, slice_num=8, H=8, W=8)
    B = 2
    N = cfg["H"] * cfg["W"]

    key = jax.random.PRNGKey(0)
    kx, kf, kp = jax.random.split(key, 3)
    x = jax.random.normal(kx, (B, N, cfg["space_dim"]), jnp.float32)
    fx = jax.random.normal(kf, (B, N, cfg["fun_dim"]), jnp.float32)
    params = init_params(kp, cfg)

    out = model_forward(params, cfg, x, fx)
    out = jax.block_until_ready(out)
    assert out.shape == (B, N, cfg["out_dim"])
    assert bool(jnp.all(jnp.isfinite(out)))
    print("KERNEL_OK")
</pallas_src>

<mosaic_0001>
module attributes {stable_mosaic.version = 11 : i64} {
  func.func @_preprocess_kernel(%arg0: i32, %arg1: memref<128x3xf32, #tpu.memory_space<vmem>>, %arg2: memref<3x64xf32, #tpu.memory_space<vmem>>, %arg3: memref<1x64xf32, #tpu.memory_space<vmem>>, %arg4: memref<64x32xf32, #tpu.memory_space<vmem>>, %arg5: memref<1x32xf32, #tpu.memory_space<vmem>>, %arg6: memref<128x32xf32, #tpu.memory_space<vmem>>) attributes {dimension_semantics = [#tpu.dimension_semantics<parallel>], iteration_bounds = array<i64: 1>, scalar_prefetch = 0 : i64, scratch_operands = 0 : i64, tpu.core_type = #tpu.core_type<tc>, window_params = [{transform_indices = @transform_0, window_bounds = array<i64: 128, 3>}, {pipeline_mode = #tpu.pipeline_mode<synchronous>, transform_indices = @transform_1, window_bounds = array<i64: 3, 64>}, {pipeline_mode = #tpu.pipeline_mode<synchronous>, transform_indices = @transform_2, window_bounds = array<i64: 1, 64>}, {pipeline_mode = #tpu.pipeline_mode<synchronous>, transform_indices = @transform_3, window_bounds = array<i64: 64, 32>}, {pipeline_mode = #tpu.pipeline_mode<synchronous>, transform_indices = @transform_4, window_bounds = array<i64: 1, 32>}, {transform_indices = @transform_5, window_bounds = array<i64: 128, 32>}]} {
    %c0 = arith.constant 0 : index
    %c0_0 = arith.constant 0 : index
    %0 = vector.load %arg1[%c0, %c0_0] : memref<128x3xf32, #tpu.memory_space<vmem>>, vector<128x3xf32>
    %1 = arith.truncf %0 : vector<128x3xf32> to vector<128x3xbf16>
    %c0_1 = arith.constant 0 : index
    %c0_2 = arith.constant 0 : index
    %2 = vector.load %arg2[%c0_1, %c0_2] : memref<3x64xf32, #tpu.memory_space<vmem>>, vector<3x64xf32>
    %3 = arith.truncf %2 : vector<3x64xf32> to vector<3x64xbf16>
    %cst = arith.constant dense<0.000000e+00> : vector<128x64xf32>
    %4 = tpu.matmul %1, %3, %cst {dimension_numbers = #tpu.dot_dimension_numbers<[1], [0], [0], [1], [0, 0, 1, 1], [], []>} : vector<128x3xbf16>, vector<3x64xbf16>, vector<128x64xf32> -> vector<128x64xf32>
    %c0_3 = arith.constant 0 : index
    %c0_4 = arith.constant 0 : index
    %5 = vector.load %arg3[%c0_3, %c0_4] : memref<1x64xf32, #tpu.memory_space<vmem>>, vector<1x64xf32>
    %6 = vector.broadcast %5 : vector<1x64xf32> to vector<128x64xf32>
    %7 = arith.addf %4, %6 : vector<128x64xf32>
    %cst_5 = arith.constant 5.000000e-01 : f32
    %8 = vector.broadcast %cst_5 : f32 to vector<128x64xf32>
    %9 = arith.mulf %8, %7 : vector<128x64xf32>
    %cst_6 = arith.constant 0.707106769 : f32
    %10 = vector.broadcast %cst_6 : f32 to vector<128x64xf32>
    %11 = arith.mulf %7, %10 : vector<128x64xf32>
    %12 = math.erf %11 : vector<128x64xf32>
    %cst_7 = arith.constant 1.000000e+00 : f32
    %13 = vector.broadcast %cst_7 : f32 to vector<128x64xf32>
    %14 = arith.addf %13, %12 : vector<128x64xf32>
    %15 = arith.mulf %9, %14 : vector<128x64xf32>
    %16 = arith.truncf %15 : vector<128x64xf32> to vector<128x64xbf16>
    %c0_8 = arith.constant 0 : index
    %c0_9 = arith.constant 0 : index
    %17 = vector.load %arg4[%c0_8, %c0_9] : memref<64x32xf32, #tpu.memory_space<vmem>>, vector<64x32xf32>
    %18 = arith.truncf %17 : vector<64x32xf32> to vector<64x32xbf16>
    %cst_10 = arith.constant dense<0.000000e+00> : vector<128x32xf32>
    %19 = tpu.matmul %16, %18, %cst_10 {dimension_numbers = #tpu.dot_dimension_numbers<[1], [0], [0], [1], [0, 0, 1, 1], [], []>} : vector<128x64xbf16>, vector<64x32xbf16>, vector<128x32xf32> -> vector<128x32xf32>
    %c0_11 = arith.constant 0 : index
    %c0_12 = arith.constant 0 : index
    %20 = vector.load %arg5[%c0_11, %c0_12] : memref<1x32xf32, #tpu.memory_space<vmem>>, vector<1x32xf32>
    %21 = vector.broadcast %20 : vector<1x32xf32> to vector<128x32xf32>
    %22 = arith.addf %19, %21 : vector<128x32xf32>
    %c0_13 = arith.constant 0 : index
    %c0_14 = arith.constant 0 : index
    %23 = vector.load %arg6[%c0_13, %c0_14] : memref<128x32xf32, #tpu.memory_space<vmem>>, vector<128x32xf32>
    tpu.vector_store %arg6[%c0_13, %c0_14], %22 {strides = array<i32>} : memref<128x32xf32, #tpu.memory_space<vmem>>, vector<128x32xf32>,
    return
  }
  func.func @transform_0(%arg0: i32) -> (i32, i32) {
    %c0_i32 = arith.constant 0 : i32
    %c0_i32_0 = arith.constant 0 : i32
    return %arg0, %c0_i32 : i32, i32
  }
  func.func @transform_1(%arg0: i32) -> (i32, i32) {
    %c0_i32 = arith.constant 0 : i32
    %c0_i32_0 = arith.constant 0 : i32
    %c0_i32_1 = arith.constant 0 : i32
    return %c0_i32, %c0_i32_0 : i32, i32
  }
  func.func @transform_2(%arg0: i32) -> (i32, i32) {
    %c0_i32 = arith.constant 0 : i32
    %c0_i32_0 = arith.constant 0 : i32
    %c0_i32_1 = arith.constant 0 : i32
    return %c0_i32, %c0_i32_0 : i32, i32
  }
  func.func @transform_3(%arg0: i32) -> (i32, i32) {
    %c0_i32 = arith.constant 0 : i32
    %c0_i32_0 = arith.constant 0 : i32
    %c0_i32_1 = arith.constant 0 : i32
    return %c0_i32, %c0_i32_0 : i32, i32
  }
  func.func @transform_4(%arg0: i32) -> (i32, i32) {
    %c0_i32 = arith.constant 0 : i32
    %c0_i32_0 = arith.constant 0 : i32
    %c0_i32_1 = arith.constant 0 : i32
    return %c0_i32, %c0_i32_0 : i32, i32
  }
  func.func @transform_5(%arg0: i32) -> (i32, i32) {
    %c0_i32 = arith.constant 0 : i32
    %c0_i32_0 = arith.constant 0 : i32
    return %arg0, %c0_i32 : i32, i32
  }
}

</mosaic_0001>

<bundles_post_ra>
// kernel: tpu_custom_call.1
= control target key start
LH: loop header
LB: loop body
LE: loop exit
PB: predicated region body
PF: predicated region fallthrough
CT: control target
= control target key end

     0   :  { %vm79_vm0 = vcmask 1040384   ;;  %vm80_vm1 = vcmask 1041408   ;;  %v547_v1 = vmov 65535   ;;  %vm54_vm2 = vcmask 23552   ;;  %s789_s1 = inlined_call_operand.vmem [shape: f32[3,64], index: 1, kind: input, shape index: {}]   ;;  %s790_s0 = inlined_call_operand.vmem [shape: f32[128,3], index: 0, kind: input, shape index: {}]   ;;  %s791_s3 = inlined_call_operand.vmem [shape: f32[64,32], index: 3, kind: input, shape index: {}]   ;;  %s792_s2 = inlined_call_operand.vmem [shape: f32[1,64], index: 2, kind: input, shape index: {}]   ;;  %s793_s4 = inlined_call_operand.vmem [shape: f32[1,32], index: 4, kind: input, shape index: {}]   ;;  %s794_s5 = inlined_call_operand.vmem [shape: f32[128,32], index: 5, kind: output, shape index: {}]  }
   0x1   :  { %v45_v0 = vld [vmem:[%s789_s1] sm:$0x7]  ;;  %v81_v2 = vsel %vm79_vm0, 4294967295, %v547_v1  ;;  %v22_v4 = vld [vmem:[%s790_s0 + $0x8] sm:$0xff]  ;;  %v23_v8 = vld [vmem:[%s790_s0 + $0x10] sm:$0xff]  ;;  %vm290_vm3 = vcmask 523264  }
   0x2   :  { %v21_v3 = vld [vmem:[%s790_s0] sm:$0xff]  ;;  %v46_v5 = vpack.c.bf16 %v45_v0, %v45_v0  ;;  %v82_v6 = vsel %vm80_vm1, %v81_v2, 0  ;;  %v24_v9 = vld [vmem:[%s790_s0 + $0x18] sm:$0xff]  ;;  %v26_v12 = vld [vmem:[%s790_s0 + $0x28] sm:$0xff]  ;;  %vm412_vm4 = vcmask 261120  }
   0x3   :  { %v37_v7 = vpack.c.bf16 %v22_v4, %v21_v3  ;;  %v25_v11 = vld [vmem:[%s790_s0 + $0x20] sm:$0xff]  ;;  %v38_v13 = vpack.c.bf16 %v24_v9, %v23_v8  ;;  %v27_v15 = vld [vmem:[%s790_s0 + $0x30] sm:$0xff]  ;;  %v28_v16 = vld [vmem:[%s790_s0 + $0x38] sm:$0xff] }
   0x4   :  { %v84_v10 = vand.u32 %v82_v6, %v46_v5  ;;  %v39_v14 = vpack.c.bf16 %v26_v12, %v25_v11  ;;  %v29_v17 = vld [vmem:[%s790_s0 + $0x40] sm:$0xff]  ;;  %v30_v18 = vld [vmem:[%s790_s0 + $0x48] sm:$0xff]  ;;  %v40_v19 = vpack.c.bf16 %v28_v16, %v27_v15  ;;  %v31_v21 = vld [vmem:[%s790_s0 + $0x50] sm:$0xff] }
   0x5   :  { %474 = vmatprep.mubr.msk.bf16.mxu0 %vm54_vm2, %v37_v7  ;;  %v41_v20 = vpack.c.bf16 %v30_v18, %v29_v17  ;;  %v32_v22 = vld [vmem:[%s790_s0 + $0x58] sm:$0xff]  ;;  %v33_v23 = vld [vmem:[%s790_s0 + $0x60] sm:$0xff]  ;;  %v34_v24 = vld [vmem:[%s790_s0 + $0x68] sm:$0xff] }
   0x6   :  { %472 = vmatprep.subr.bf16.mxu0 %v84_v10  ;;  %v42_v25 = vpack.c.bf16 %v32_v22, %v31_v21  ;;  %v43_v26 = vpack.c.bf16 %v34_v24, %v33_v23  ;;  %v35_v27 = vld [vmem:[%s790_s0 + $0x70] sm:$0xff]  ;;  %v36_v28 = vld [vmem:[%s790_s0 + $0x78] sm:$0xff]  ;;  %v275_v33 = vld [vmem:[%s791_s3 + $0x20] sm:$0xff] }
   0x7   :  { %473 = vmatpush3.bf16.msra.mxu0 %v84_v10  ;;  %v44_v29 = vpack.c.bf16 %v36_v28, %v35_v27  ;;  %v277_v30 = vld [vmem:[%s791_s3 + $0x30] sm:$0xff]  ;;  %v278_v31 = vld [vmem:[%s791_s3 + $0x38] sm:$0xff]  ;;  %v276_v34 = vld [vmem:[%s791_s3 + $0x28] sm:$0xff] }
   0x8   :  { %v282_v32 = vpack.c.bf16 %v278_v31, %v277_v30  ;;  %v281_v35 = vpack.c.bf16 %v276_v34, %v275_v33  ;;  %v273_v36 = vld [vmem:[%s791_s3 + $0x10] sm:$0xff]  ;;  %v274_v37 = vld [vmem:[%s791_s3 + $0x18] sm:$0xff]  ;;  %v271_v39 = vld [vmem:[%s791_s3] sm:$0xff] }
   0x9   :  { %v280_v38 = vpack.c.bf16 %v274_v37, %v273_v36  ;;  %v272_v40 = vld [vmem:[%s791_s3 + $0x8] sm:$0xff]  ;;  %v664_v42 = vld [vmem:[%s792_s2] ss:$0 sm:$0xff] }
   0xa   :  { %475 = vmatmul.mubr.msk.bf16.vlgmr.msra.gmra.mxu0 %vm54_vm2, %v38_v13  ;;  %490 = vmatprep.subr.bf16.mxu1 %v282_v32  ;;  %v279_v41 = vpack.c.bf16 %v272_v40, %v271_v39 }
   0xb   :  { %478 = vmatprep.mubr.msk.bf16.mxu0 %vm54_vm2, %v39_v14  ;;  %491 = vmatpush3.bf16.msra.mxu1 %v282_v32 }
   0xc   :  { %492 = vmatprep.subr.bf16.mxu1 %v281_v35 }
   0xf   :  { %493 = vmatpush3.bf16.msra.mxu1 %v281_v35 }
  0x10   :  { %494 = vmatprep.subr.bf16.mxu1 %v280_v38 }
  0x12   :  { %479 = vmatmul.mubr.msk.bf16.gmra.mxu0 %vm54_vm2, %v40_v19 }
  0x13   :  { %482 = vmatprep.mubr.msk.bf16.mxu0 %vm54_vm2, %v41_v20  ;;  %495 = vmatpush3.bf16.msra.mxu1 %v280_v38 }
  0x14   :  { %496 = vmatprep.subr.bf16.mxu1 %v279_v41 }
  0x17   :  { %497 = vmatpush3.bf16.msra.mxu1 %v279_v41 }
  0x1a   :  { %483 = vmatmul.mubr.msk.bf16.gmra.mxu0 %vm54_vm2, %v42_v25 }
  0x1b   :  { %486 = vmatprep.mubr.msk.bf16.mxu0 %vm54_vm2, %v43_v26 }
  0x22   :  { %487 = vmatmul.mubr.msk.bf16.gmra.mxu0 %vm54_vm2, %v44_v29 }
  0xca   :  { %v476_v43 = vpop.f32.mrf.mxu0 }
  0xcb   :  { %v129_v44 = vadd.f32 %v476_v43, %v664_v42 }
  0xcc   :  { %v120_v45 = vpop.f32.mrf.mxu0 }
  0xcd   :  { %v201_v46 = vmul.f32 0.70710677, %v129_v44  ;;  %v121_v47 = vadd.f32 %v664_v42, %v120_v45  ;;  %v185_v23 = vmul.f32 0.5, %v129_v44 }
  0xce   :  { %v477_v48 = vpop.f32.mrf.mxu0 }
  0xcf   :  { %v199_v49 = vmul.f32 0.70710677, %v121_v47  ;;  %v132_v50 = vadd.f32 %v477_v48, %v664_v42  ;;  %515 = verf.f32 %v201_v46  ;;  %v183_v24 = vmul.f32 0.5, %v121_v47 }
  0xd0   :  { %v123_v51 = vpop.f32.mrf.mxu0 }
  0xd1   :  { %v202_v52 = vmul.f32 0.70710677, %v132_v50  ;;  %v124_v53 = vadd.f32 %v664_v42, %v123_v51  ;;  %517 = verf.f32 %v199_v49  ;;  %v186_v20 = vmul.f32 0.5, %v132_v50 }
  0xd2   :  { %v480_v54 = vpop.f32.mrf.mxu0 }
  0xd3   :  { %519 = verf.f32 %v202_v52  ;;  %v200_v55 = vmul.f32 0.70710677, %v124_v53  ;;  %v671_v56 = vadd.f32 %v480_v54, %v664_v42  ;;  %v184_v27 = vmul.f32 0.5, %v124_v53 }
  0xd4   :  { %v136_v57 = vpop.f32.mrf.mxu0 }
  0xd5   :  { %521 = verf.f32 %v200_v55  ;;  %v674_v58 = vadd.f32 %v664_v42, %v136_v57  ;;  %v205_v59 = vmul.f32 0.70710677, %v671_v56 }
  0xd6   :  { %v481_v60 = vpop.f32.mrf.mxu0 }
  0xd7   :  { %v203_v61 = vmul.f32 0.70710677, %v674_v58  ;;  %v148_v62 = vadd.f32 %v481_v60, %v664_v42  ;;  %v187_v50 = vmul.f32 0.5, %v674_v58 }
  0xd8   :  { %v139_v63 = vpop.f32.mrf.mxu0 }
  0xd9   :  { %523 = verf.f32 %v203_v61  ;;  %v206_v0 = vmul.f32 0.70710677, %v148_v62  ;;  %v140_v1 = vadd.f32 %v664_v42, %v139_v63  ;;  %v190_v51 = vmul.f32 0.5, %v148_v62 }
  0xda   :  { %525 = verf.f32 %v205_v59  ;;  %v484_v2 = vpop.f32.mrf.mxu0  ;;  %v189_v59 = vmul.f32 0.5, %v671_v56 }
  0xdb   :  { %527 = verf.f32 %v206_v0  ;;  %v204_v3 = vmul.f32 0.70710677, %v140_v1  ;;  %v681_v4 = vadd.f32 %v484_v2, %v664_v42  ;;  %v188_v52 = vmul.f32 0.5, %v140_v1 }
  0xdc   :  { %v152_v5 = vpop.f32.mrf.mxu0  ;;  %v516_v7 = vpop.eup %515 }
  0xdd   :  { %529 = verf.f32 %v204_v3  ;;  %v209_v6 = vmul.f32 0.70710677, %v681_v4  ;;  %v685_v8 = vadd.f32 %v664_v42, %v152_v5  ;;  %v233_v19 = vadd.f32 1.0, %v516_v7 }
  0xde   :  { %v485_v9 = vpop.f32.mrf.mxu0  ;;  %v518_v10 = vpop.eup %517 }
  0xdf   :  { %v688_v11 = vadd.f32 %v485_v9, %v664_v42  ;;  %v207_v13 = vmul.f32 0.70710677, %v685_v8  ;;  %531 = verf.f32 %v209_v6  ;;  %v231_v22 = vadd.f32 1.0, %v518_v10 }
  0xe0   :  { %v520_v12 = vpop.eup %519  ;;  %v155_v14 = vpop.f32.mrf.mxu0  ;;  %v249_v33 = vmul.f32 %v233_v19, %v185_v23  ;;  %v191_v7 = vmul.f32 0.5, %v685_v8 }
  0xe1   :  { %v234_v15 = vadd.f32 1.0, %v520_v12  ;;  %v210_v16 = vmul.f32 0.70710677, %v688_v11  ;;  %v693_v17 = vadd.f32 %v664_v42, %v155_v14  ;;  %533 = verf.f32 %v207_v13 }
  0xe2   :  { %v522_v18 = vpop.eup %521  ;;  %v488_v21 = vpop.f32.mrf.mxu0  ;;  %v247_v35 = vmul.f32 %v231_v22, %v183_v24  ;;  %v194_v56 = vmul.f32 0.5, %v688_v11  ;;  %v193_v13 = vmul.f32 0.5, %v681_v4 }
  0xe3   :  { %535 = verf.f32 %v210_v16  ;;  %v208_v25 = vmul.f32 0.70710677, %v693_v17  ;;  %v250_v26 = vmul.f32 %v234_v15, %v186_v20  ;;  %v697_v28 = vadd.f32 %v488_v21, %v664_v42 }
  0xe4   :  { %v168_v29 = vpop.f32.mrf.mxu0  ;;  %v232_v30 = vadd.f32 1.0, %v522_v18  ;;  %v192_v10 = vmul.f32 0.5, %v693_v17 }
  0xe5   :  { %537 = verf.f32 %v208_v25  ;;  %v700_v31 = vadd.f32 %v664_v42, %v168_v29  ;;  %v213_v38 = vmul.f32 0.70710677, %v697_v28  ;;  %v264_v41 = vpack.c.bf16 %v250_v26, %v249_v33 }
  0xe6   :  { %v524_v32 = vpop.eup %523  ;;  %v489_v34 = vpop.f32.mrf.mxu0  ;;  %v248_v36 = vmul.f32 %v232_v30, %v184_v27  ;;  %v197_v29 = vmul.f32 0.5, %v697_v28 }
  0xe7   :  { %v526_v37 = vpop.eup %525  ;;  %v211_v39 = vmul.f32 0.70710677, %v700_v31  ;;  %v180_v43 = vadd.f32 %v489_v34, %v664_v42  ;;  %v235_v46 = vadd.f32 1.0, %v524_v32  ;;  %v195_v17 = vmul.f32 0.5, %v700_v31  ;;  %v442_v31 = vld [vmem:[%s793_s4] ss:$0 sm:$0xff] }
  0xe8   :  { %v528_v40 = vpop.eup %527  ;;  %v171_v44 = vpop.f32.mrf.mxu0  ;;  %v263_v45 = vpack.c.bf16 %v248_v36, %v247_v35  ;;  %v237_v54 = vadd.f32 1.0, %v526_v37 }
  0xe9   :  { %v238_v47 = vadd.f32 1.0, %v528_v40  ;;  %539 = verf.f32 %v211_v39  ;;  %v172_v48 = vadd.f32 %v664_v42, %v171_v44  ;;  %v214_v53 = vmul.f32 0.70710677, %v180_v43 }
  0xea   :  { %v530_v49 = vpop.eup %529  ;;  %498 = vmatprep.mubr.msk.bf16.mxu1 %vm290_vm3, %v263_v45  ;;  %541 = verf.f32 %v213_v38  ;;  %v251_v60 = vmul.f32 %v235_v46, %v187_v50  ;;  %v253_v62 = vmul.f32 %v237_v54, %v189_v59  ;;  %v198_v26 = vmul.f32 0.5, %v180_v43 }
  0xeb   :  { %v236_v55 = vadd.f32 1.0, %v530_v49  ;;  %v212_v57 = vmul.f32 0.70710677, %v172_v48  ;;  %499 = vmatmul.mubr.msk.bf16.vlgmr.msra.gmra.mxu1 %vm290_vm3, %v264_v41  ;;  %543 = verf.f32 %v214_v53  ;;  %v254_v61 = vmul.f32 %v238_v47, %v190_v51 }
  0xec   :  { %v532_v63 = vpop.eup %531  ;;  %v196_v27 = vmul.f32 0.5, %v172_v48 }
  0xed   :  { %v252_v42 = vmul.f32 %v236_v55, %v188_v52  ;;  %545 = verf.f32 %v212_v57  ;;  %v266_v2 = vpack.c.bf16 %v254_v61, %v253_v62  ;;  %v241_v9 = vadd.f32 1.0, %v532_v63 }
  0xee   :  { %v534_v58 = vpop.eup %533 }
  0xef   :  { %v265_v0 = vpack.c.bf16 %v252_v42, %v251_v60  ;;  %v239_v3 = vadd.f32 1.0, %v534_v58  ;;  %v257_v19 = vmul.f32 %v241_v9, %v193_v13 }
  0xf0   :  { %v536_v1 = vpop.eup %535 }
  0xf1   :  { %v242_v5 = vadd.f32 1.0, %v536_v1  ;;  %502 = vmatprep.mubr.msk.bf16.mxu1 %vm290_vm3, %v265_v0  ;;  %v255_v14 = vmul.f32 %v239_v3, %v191_v7 }
  0xf2   :  { %v538_v6 = vpop.eup %537 }
  0xf3   :  { %v240_v12 = vadd.f32 1.0, %v538_v6  ;;  %503 = vmatmul.mubr.msk.bf16.gmra.mxu1 %vm290_vm3, %v266_v2  ;;  %v258_v15 = vmul.f32 %v242_v5, %v194_v56 }
  0xf5   :  { %v256_v16 = vmul.f32 %v240_v12, %v192_v10  ;;  %v268_v23 = vpack.c.bf16 %v258_v15, %v257_v19 }
  0xf6   :  { %v540_v18 = vpop.eup %539 }
  0xf7   :  { %v267_v20 = vpack.c.bf16 %v256_v16, %v255_v14  ;;  %v542_v21 = vpop.eup %541  ;;  %v243_v8 = vadd.f32 1.0, %v540_v18 }
  0xf8   :  { %v544_v22 = vpop.eup %543  ;;  %v245_v25 = vadd.f32 1.0, %v542_v21 }
  0xf9   :  { %506 = vmatprep.mubr.msk.bf16.mxu1 %vm290_vm3, %v267_v20  ;;  %v246_v24 = vadd.f32 1.0, %v544_v22  ;;  %v259_v30 = vmul.f32 %v243_v8, %v195_v17 }
  0xfa   :  { %v546_v11 = vpop.eup %545  ;;  %v261_v34 = vmul.f32 %v245_v25, %v197_v29 }
  0xfb   :  { %v244_v4 = vadd.f32 1.0, %v546_v11  ;;  %507 = vmatmul.mubr.msk.bf16.gmra.mxu1 %vm290_vm3, %v268_v23  ;;  %v262_v32 = vmul.f32 %v246_v24, %v198_v26 }
  0xfd   :  { %v260_v33 = vmul.f32 %v244_v4, %v196_v27  ;;  %v270_v36 = vpack.c.bf16 %v262_v32, %v261_v34 }
  0xff   :  { %v269_v35 = vpack.c.bf16 %v260_v33, %v259_v30 }
 0x101   :  { %510 = vmatprep.mubr.msk.bf16.mxu1 %vm290_vm3, %v269_v35 }
 0x103   :  { %511 = vmatmul.mubr.msk.bf16.gmra.mxu1 %vm290_vm3, %v270_v36 }
 0x1ab   :  { %v500_v37 = vpop.f32.mrf.mxu1 }
 0x1ac   :  { %v358_v38 = vadd.f32 %v500_v37, %v442_v31 }
 0x1ad   :  { %v349_v39 = vpop.f32.mrf.mxu1 }
 0x1ae   :  { %415 = vst.msk [vmem:[%s794_s5 + $0x10] sm:$0xff] %vm412_vm4, %v358_v38  ;;  %v350_v28 = vadd.f32 %v442_v31, %v349_v39 }
 0x1af   :  { %v501_v40 = vpop.f32.mrf.mxu1 }
 0x1b0   :  { %413 = vst.msk [vmem:[%s794_s5] sm:$0xff] %vm412_vm4, %v350_v28  ;;  %v361_v41 = vadd.f32 %v501_v40, %v442_v31 }
 0x1b1   :  { %v352_v43 = vpop.f32.mrf.mxu1 }
 0x1b2   :  { %416 = vst.msk [vmem:[%s794_s5 + $0x18] sm:$0xff] %vm412_vm4, %v361_v41  ;;  %v353_v44 = vadd.f32 %v442_v31, %v352_v43 }
 0x1b3   :  { %v504_v45 = vpop.f32.mrf.mxu1 }
 0x1b4   :  { %414 = vst.msk [vmem:[%s794_s5 + $0x8] sm:$0xff] %vm412_vm4, %v353_v44  ;;  %v374_v46 = vadd.f32 %v504_v45, %v442_v31 }
 0x1b5   :  { %v365_v47 = vpop.f32.mrf.mxu1 }
 0x1b6   :  { %419 = vst.msk [vmem:[%s794_s5 + $0x30] sm:$0xff] %vm412_vm4, %v374_v46  ;;  %v366_v48 = vadd.f32 %v442_v31, %v365_v47 }
 0x1b7   :  { %v505_v49 = vpop.f32.mrf.mxu1 }
 0x1b8   :  { %417 = vst.msk [vmem:[%s794_s5 + $0x20] sm:$0xff] %vm412_vm4, %v366_v48  ;;  %v377_v50 = vadd.f32 %v505_v49, %v442_v31 }
 0x1b9   :  { %v368_v51 = vpop.f32.mrf.mxu1 }
 0x1ba   :  { %420 = vst.msk [vmem:[%s794_s5 + $0x38] sm:$0xff] %vm412_vm4, %v377_v50  ;;  %v369_v52 = vadd.f32 %v442_v31, %v368_v51 }
 0x1bb   :  { %v508_v53 = vpop.f32.mrf.mxu1 }
 0x1bc   :  { %418 = vst.msk [vmem:[%s794_s5 + $0x28] sm:$0xff] %vm412_vm4, %v369_v52  ;;  %v390_v54 = vadd.f32 %v508_v53, %v442_v31 }
 0x1bd   :  { %v381_v55 = vpop.f32.mrf.mxu1 }
 0x1be   :  { %423 = vst.msk [vmem:[%s794_s5 + $0x50] sm:$0xff] %vm412_vm4, %v390_v54  ;;  %v382_v57 = vadd.f32 %v442_v31, %v381_v55 }
 0x1bf   :  { %v509_v59 = vpop.f32.mrf.mxu1 }
 0x1c0   :  { %421 = vst.msk [vmem:[%s794_s5 + $0x40] sm:$0xff] %vm412_vm4, %v382_v57  ;;  %v393_v60 = vadd.f32 %v509_v59, %v442_v31 }
 0x1c1   :  { %v384_v61 = vpop.f32.mrf.mxu1 }
 0x1c2   :  { %424 = vst.msk [vmem:[%s794_s5 + $0x58] sm:$0xff] %vm412_vm4, %v393_v60  ;;  %v385_v42 = vadd.f32 %v442_v31, %v384_v61 }
 0x1c3   :  { %v512_v63 = vpop.f32.mrf.mxu1 }
 0x1c4   :  { %422 = vst.msk [vmem:[%s794_s5 + $0x48] sm:$0xff] %vm412_vm4, %v385_v42  ;;  %v406_v58 = vadd.f32 %v512_v63, %v442_v31 }
 0x1c5   :  { %v397_v62 = vpop.f32.mrf.mxu1 }
 0x1c6   :  { %427 = vst.msk [vmem:[%s794_s5 + $0x70] sm:$0xff] %vm412_vm4, %v406_v58  ;;  %v398_v0 = vadd.f32 %v442_v31, %v397_v62 }
 0x1c7   :  { %v513_v1 = vpop.f32.mrf.mxu1 }
 0x1c8   :  { %425 = vst.msk [vmem:[%s794_s5 + $0x60] sm:$0xff] %vm412_vm4, %v398_v0  ;;  %v409_v2 = vadd.f32 %v513_v1, %v442_v31 }
 0x1c9   :  { %v400_v3 = vpop.f32.mrf.mxu1 }
 0x1ca   :  { %428 = vst.msk [vmem:[%s794_s5 + $0x78] sm:$0xff] %vm412_vm4, %v409_v2  ;;  %v401_v5 = vadd.f32 %v442_v31, %v400_v3 }
 0x1cc   :  { %426 = vst.msk [vmem:[%s794_s5 + $0x68] sm:$0xff] %vm412_vm4, %v401_v5 }

</bundles_post_ra>
